<compile_context>
chip_gen: v5e
topology: v5e:2x2
jax: 0.10.0
libtpu: 0.0.40
codegen_flags: <defaults>
</compile_context>

<pallas_src>
import jax
import jax.numpy as jnp
import numpy as np
from jax.experimental import pallas as pl
from jax.experimental.pallas import tpu as pltpu


# ----------------------------------------------------------------------------
# Parameter glue: build dense K once per parameter update (NOT per forward).
# ----------------------------------------------------------------------------
def build_koopman_operator(K_diag, K_upper):
    """Dense [D, D] Koopman operator from packed parameters (pure JAX glue)."""
    D = K_diag.shape[0]
    iu, ju = np.triu_indices(D, k=1)          # static indices
    U = jnp.zeros((D, D), dtype=jnp.float32).at[iu, ju].set(
        K_upper.astype(jnp.float32)
    )
    K = U - U.T                                # skew-symmetric, zero diagonal
    K = K + jnp.diag(jax.nn.relu(K_diag.astype(jnp.float32)))
    return K


# ----------------------------------------------------------------------------
# Pallas kernels
# ----------------------------------------------------------------------------
def _apply_kernel(g_ref, k_ref, o_ref):
    """One MXU pass per batch tile: o = g @ K."""
    o_ref[...] = jnp.dot(
        g_ref[...], k_ref[...], preferred_element_type=jnp.float32
    ).astype(o_ref.dtype)


def _rollout_kernel(g_ref, k_ref, o_ref, g_carry):
    """Streaming T-step rollout.

    grid = (batch_tiles, T); the state for the current batch tile is carried in
    a VMEM scratch across the T ("arbitrary") axis and each step writes one
    (1, tm, Dp) output block.
    """
    t = pl.program_id(1)

    @pl.when(t == 0)
    def _():
        g_carry[...] = g_ref[...].astype(jnp.float32)

    g_next = jnp.dot(
        g_carry[...].astype(k_ref.dtype), k_ref[...],
        preferred_element_type=jnp.float32,
    )
    g_carry[...] = g_next
    o_ref[0] = g_next.astype(o_ref.dtype)


# ----------------------------------------------------------------------------
# Wrapper helpers
# ----------------------------------------------------------------------------
def _round_up(x, m):
    return (x + m - 1) // m * m


def _resident_spec(shape, index_map):
    """Single-buffered BlockSpec for an operand whose block never changes."""
    try:
        return pl.BlockSpec(shape, index_map, pipeline_mode=pl.Buffered(1))
    except TypeError:  # older JAX without pipeline_mode support
        return pl.BlockSpec(shape, index_map)


_VMEM_BUDGET = 40 << 20  # target working-set bound; fits v7x's 64 MiB physical


def _pick_tm(B, Dp, block_m, extra_per_row_bytes, k_bytes):
    """Largest batch tile (multiple of 8) whose working set fits the budget."""
    tm = min(block_m, _round_up(B, 8))
    tm = _round_up(tm, 8)
    while tm > 8 and (tm * extra_per_row_bytes + k_bytes) > _VMEM_BUDGET:
        tm = max(8, (tm // 2 // 8) * 8)
    return tm


def _vmem_limit(need_bytes):
    return int(min(max(need_bytes + (8 << 20), 32 << 20), 64 << 20))


# ----------------------------------------------------------------------------
# Wrappers
# ----------------------------------------------------------------------------
def koopman_apply(g, K, *, block_m=512, use_bf16=False):
    """g: [B, D], K: [D, D] dense operator -> [B, D] (float32)."""
    B, D = g.shape
    assert K.shape == (D, D)

    in_dtype = jnp.bfloat16 if use_bf16 else jnp.float32
    esz = jnp.dtype(in_dtype).itemsize

    # Lane-dense feature dim: pad D up to a multiple of 128 with zeros.
    Dp = _round_up(D, 128)
    g = g.astype(in_dtype)
    K = K.astype(in_dtype)
    if Dp != D:
        g = jnp.pad(g, ((0, 0), (0, Dp - D)))
        K = jnp.pad(K, ((0, Dp - D), (0, Dp - D)))

    # Working set per grid step: double-buffered g tile + double-buffered f32
    # out tile + K (counted twice to stay safe even without Buffered(1)).
    per_row = 2 * Dp * esz + 2 * Dp * 4
    k_bytes = 2 * Dp * Dp * esz
    tm = _pick_tm(B, Dp, block_m, per_row, k_bytes)
    Bp = _round_up(B, tm)
    if Bp != B:
        g = jnp.pad(g, ((0, Bp - B), (0, 0)))

    need = tm * per_row + k_bytes

    out = pl.pallas_call(
        _apply_kernel,
        out_shape=jax.ShapeDtypeStruct((Bp, Dp), jnp.float32),
        grid_spec=pltpu.PrefetchScalarGridSpec(
            num_scalar_prefetch=0,
            grid=(Bp // tm,),
            in_specs=[
                pl.BlockSpec((tm, Dp), lambda i: (i, 0)),
                _resident_spec((Dp, Dp), lambda i: (0, 0)),
            ],
            out_specs=pl.BlockSpec((tm, Dp), lambda i: (i, 0)),
        ),
        compiler_params=pltpu.CompilerParams(
            dimension_semantics=("parallel",),
            vmem_limit_bytes=_vmem_limit(need),
        ),
        cost_estimate=pl.CostEstimate(
            flops=2 * Bp * Dp * Dp,
            transcendentals=0,
            bytes_accessed=esz * (Bp * Dp + Dp * Dp) + 4 * Bp * Dp,
        ),
    )(g, K)
    return out[:B, :D]


def koopman_forward(g, K_diag, K_upper):
    """Module-equivalent forward: [B, D] -> [B, D].

    NOTE: in a training/rollout loop, call build_koopman_operator once per
    parameter update and reuse the dense K with koopman_apply / koopman_rollout.
    """
    K = build_koopman_operator(K_diag, K_upper)
    return koopman_apply(g, K)


def koopman_rollout(g, K, num_steps, *, block_m=512, use_bf16=False):
    """Apply K for `num_steps` steps in a single pallas_call. Returns [T, B, D]."""
    B, D = g.shape
    assert K.shape == (D, D)

    in_dtype = jnp.bfloat16 if use_bf16 else jnp.float32
    esz = jnp.dtype(in_dtype).itemsize

    Dp = _round_up(D, 128)
    g = g.astype(jnp.float32)          # state carried in f32
    K = K.astype(in_dtype)
    if Dp != D:
        g = jnp.pad(g, ((0, 0), (0, Dp - D)))
        K = jnp.pad(K, ((0, Dp - D), (0, Dp - D)))

    # Per grid step: double-buffered g-in tile (f32) + double-buffered out tile
    # (f32) + f32 carry scratch + K (counted twice for safety).
    per_row = 2 * Dp * 4 + 2 * Dp * 4 + Dp * 4
    k_bytes = 2 * Dp * Dp * esz
    tm = _pick_tm(B, Dp, block_m, per_row, k_bytes)
    Bp = _round_up(B, tm)
    if Bp != B:
        g = jnp.pad(g, ((0, Bp - B), (0, 0)))

    need = tm * per_row + k_bytes

    out = pl.pallas_call(
        _rollout_kernel,
        out_shape=jax.ShapeDtypeStruct((num_steps, Bp, Dp), jnp.float32),
        grid_spec=pltpu.PrefetchScalarGridSpec(
            num_scalar_prefetch=0,
            grid=(Bp // tm, num_steps),
            in_specs=[
                pl.BlockSpec((tm, Dp), lambda i, t: (i, 0)),
                _resident_spec((Dp, Dp), lambda i, t: (0, 0)),
            ],
            out_specs=pl.BlockSpec((1, tm, Dp), lambda i, t: (t, i, 0)),
            scratch_shapes=[pltpu.VMEM((tm, Dp), jnp.float32)],
        ),
        compiler_params=pltpu.CompilerParams(
            dimension_semantics=("parallel", "arbitrary"),
            vmem_limit_bytes=_vmem_limit(need),
        ),
        cost_estimate=pl.CostEstimate(
            flops=2 * num_steps * Bp * Dp * Dp,
            transcendentals=0,
            bytes_accessed=4 * Bp * Dp + esz * Dp * Dp + 4 * num_steps * Bp * Dp,
        ),
    )(g, K)
    return out[:, :B, :D]


# ----------------------------------------------------------------------------
# Pure-JAX reference matching the PyTorch module
# ----------------------------------------------------------------------------
def koopman_reference_operator(K_diag, K_upper):
    D = K_diag.shape[0]
    iu, ju = np.triu_indices(D, k=1)
    K = jnp.zeros((D, D), dtype=jnp.float32)
    K = K.at[iu, ju].set(K_upper)
    K = K.at[ju, iu].set(-K_upper)
    K = K.at[jnp.arange(D), jnp.arange(D)].set(jax.nn.relu(K_diag))
    return K


def koopman_reference(g, K_diag, K_upper):
    return g @ koopman_reference_operator(K_diag, K_upper)


if __name__ == "__main__":
    dim = 32
    batch = 8
    steps = 4

    key = jax.random.PRNGKey(0)
    k1, k2, k3 = jax.random.split(key, 3)

    # Parameter init mirroring the PyTorch __init__ shapes:
    #   K_diag  ~ U[0,1)      shape (dim,)
    #   K_upper ~ 0.01*N(0,1) shape (dim*(dim-1)/2,)
    K_diag = jax.random.uniform(k1, (dim,), dtype=jnp.float32)
    K_upper = 0.01 * jax.random.normal(
        k2, (dim * (dim - 1) // 2,), dtype=jnp.float32
    )
    g = jax.random.normal(k3, (batch, dim), dtype=jnp.float32)

    # 1) Module-equivalent single-step forward.
    out = koopman_forward(g, K_diag, K_upper)
    out = jax.block_until_ready(out)
    ref = koopman_reference(g, K_diag, K_upper)
    np.testing.assert_allclose(
        np.asarray(out), np.asarray(ref), rtol=1e-5, atol=1e-5
    )

    # 2) Fused multi-step rollout: K built once (cached glue), applied T times
    #    inside a single pallas_call with K resident on-chip and outputs streamed.
    K = jax.block_until_ready(jax.jit(build_koopman_operator)(K_diag, K_upper))
    traj = jax.block_until_ready(koopman_rollout(g, K, steps))

    K_ref = koopman_reference_operator(K_diag, K_upper)
    gr = g
    ref_steps = []
    for _ in range(steps):
        gr = gr @ K_ref
        ref_steps.append(gr)
    ref_traj = jnp.stack(ref_steps, axis=0)
    np.testing.assert_allclose(
        np.asarray(traj), np.asarray(ref_traj), rtol=1e-5, atol=1e-5
    )

    print("KERNEL_OK")
</pallas_src>

<mosaic_0001>
module attributes {stable_mosaic.version = 11 : i64} {
  func.func @_apply_kernel(%arg0: i32, %arg1: memref<8x128xf32, #tpu.memory_space<vmem>>, %arg2: memref<128x128xf32, #tpu.memory_space<vmem>>, %arg3: memref<8x128xf32, #tpu.memory_space<vmem>>) attributes {dimension_semantics = [#tpu.dimension_semantics<parallel>], iteration_bounds = array<i64: 1>, scalar_prefetch = 0 : i64, scratch_operands = 0 : i64, tpu.core_type = #tpu.core_type<tc>, window_params = [{transform_indices = @transform_0, window_bounds = array<i64: 8, 128>}, {pipeline_mode = #tpu.pipeline_mode<synchronous>, transform_indices = @transform_1, window_bounds = array<i64: 128, 128>}, {transform_indices = @transform_2, window_bounds = array<i64: 8, 128>}]} {
    %c0 = arith.constant 0 : index
    %c0_0 = arith.constant 0 : index
    %0 = vector.load %arg1[%c0, %c0_0] : memref<8x128xf32, #tpu.memory_space<vmem>>, vector<8x128xf32>
    %c0_1 = arith.constant 0 : index
    %c0_2 = arith.constant 0 : index
    %1 = vector.load %arg2[%c0_1, %c0_2] : memref<128x128xf32, #tpu.memory_space<vmem>>, vector<128x128xf32>
    %cst = arith.constant dense<0.000000e+00> : vector<8x128xf32>
    %2 = tpu.matmul %0, %1, %cst {dimension_numbers = #tpu.dot_dimension_numbers<[1], [0], [0], [1], [0, 0, 1, 1], [], []>} : vector<8x128xf32>, vector<128x128xf32>, vector<8x128xf32> -> vector<8x128xf32>
    %c0_3 = arith.constant 0 : index
    %c0_4 = arith.constant 0 : index
    %3 = vector.load %arg3[%c0_3, %c0_4] : memref<8x128xf32, #tpu.memory_space<vmem>>, vector<8x128xf32>
    tpu.vector_store %arg3[%c0_3, %c0_4], %2 {strides = array<i32>} : memref<8x128xf32, #tpu.memory_space<vmem>>, vector<8x128xf32>,
    return
  }
  func.func @transform_0(%arg0: i32) -> (i32, i32) {
    %c0_i32 = arith.constant 0 : i32
    %c0_i32_0 = arith.constant 0 : i32
    return %arg0, %c0_i32 : i32, i32
  }
  func.func @transform_1(%arg0: i32) -> (i32, i32) {
    %c0_i32 = arith.constant 0 : i32
    %c0_i32_0 = arith.constant 0 : i32
    %c0_i32_1 = arith.constant 0 : i32
    return %c0_i32, %c0_i32_0 : i32, i32
  }
  func.func @transform_2(%arg0: i32) -> (i32, i32) {
    %c0_i32 = arith.constant 0 : i32
    %c0_i32_0 = arith.constant 0 : i32
    return %arg0, %c0_i32 : i32, i32
  }
}

</mosaic_0001>

<bundles_post_ra>
// kernel: tpu_custom_call.1
= control target key start
LH: loop header
LB: loop body
LE: loop exit
PB: predicated region body
PF: predicated region fallthrough
CT: control target
= control target key end

     0   :  { %7 = vsyncpa [#allocation3], 0  ;;  %s210_s0 = inlined_call_operand.hbm [shape: f32[8,128], index: 0, kind: input, shape index: {}]   ;;  %s211_s1 = inlined_call_operand.hbm [shape: f32[128,128], index: 1, kind: input, shape index: {}]   ;;  %s212_s2 = inlined_call_operand.hbm [shape: f32[8,128], index: 2, kind: output, shape index: {}]  }
   0x1   :  { %8 = vsyncpa [#allocation6], 0 }
   0x2   :  { %9 = vsyncpa [#allocation4], 0  ;;  %s15_s11 = sshll.u32 %s210_s0, 4  ;;  %s181_s12 = smov [#allocation2]   ;;  %s16_s11 = int_to_ptr.hbm [resolvable:$true] %s15_s11 }
   0x3   :  { %s17_s13 = sshll.u32 %s181_s12, 4  ;;  %s25_s16 = sshll.u32 %s211_s1, 4  ;;  %s18_s13 = int_to_ptr.vmem [resolvable:$true] %s17_s13  ;;  %s26_s16 = int_to_ptr.hbm [resolvable:$true] %s25_s16 }
   0x4   :  { %20 = dma.hbm_to_vmem [thread:$0]  %s16_s11, 128, %s18_s13, [#allocation3]  }
   0x5   :  { %s182_s17 = smov [#allocation5]   ;;  %s183_s19 = smov 128  }
   0x6   :  { %s27_s18 = sshll.u32 %s182_s17, 4  ;;  %s184_s20 = smov 8   ;;  %s28_s18 = int_to_ptr.vmem [resolvable:$true] %s27_s18 }
   0x7   :  { %33 = dma.hbm_to_vmem [thread:$0]  %s26_s16, 2048, %s28_s18, [#allocation6], %s183_s19, %s183_s19, %s184_s20  }
   0x8   :  { %175 = dma.done.wait [#allocation3], 128  }
   0x9   :  { %176 = vsyncadd [#allocation3], 4294967168 }
   0xa   :  { %177 = dma.done.wait [#allocation6], 2048  }
   0xb   :  { %178 = vsyncadd [#allocation6], 4294965248  ;;  %v58_v0 = vld [vmem:[#allocation5 + $0x78] sm:$0xff]  ;;  %v57_v1 = vld [vmem:[#allocation5 + $0x70] sm:$0xff]  ;;  %s185_s0 = smov [#allocation7]   ;;  %s87_s23 = sshll.u32 %s212_s2, 4  ;;  %s88_s23 = int_to_ptr.hbm [resolvable:$true] %s87_s23 }
   0xc   :  { %59 = vmatpush.msra.mxu0 %v58_v0  ;;  %v56_v2 = vld [vmem:[#allocation5 + $0x68] sm:$0xff]  ;;  %v55_v3 = vld [vmem:[#allocation5 + $0x60] sm:$0xff]  ;;  %v54_v4 = vld [vmem:[#allocation5 + $0x58] sm:$0xff]  ;;  %s85_s1 = sshll.u32 %s185_s0, 4  ;;  %s86_s1 = int_to_ptr.vmem [resolvable:$true] %s85_s1 }
   0xd   :  { %v53_v5 = vld [vmem:[#allocation5 + $0x50] sm:$0xff]  ;;  %v52_v6 = vld [vmem:[#allocation5 + $0x48] sm:$0xff]  ;;  %v51_v7 = vld [vmem:[#allocation5 + $0x40] sm:$0xff] }
   0xe   :  { %60 = vmatpush.msra.mxu0 %v57_v1  ;;  %v50_v8 = vld [vmem:[#allocation5 + $0x38] sm:$0xff]  ;;  %v49_v9 = vld [vmem:[#allocation5 + $0x30] sm:$0xff]  ;;  %v48_v10 = vld [vmem:[#allocation5 + $0x28] sm:$0xff] }
   0xf   :  { %v47_v11 = vld [vmem:[#allocation5 + $0x20] sm:$0xff]  ;;  %v46_v12 = vld [vmem:[#allocation5 + $0x18] sm:$0xff]  ;;  %v45_v13 = vld [vmem:[#allocation5 + $0x10] sm:$0xff] }
  0x10   :  { %61 = vmatpush.msra.mxu0 %v56_v2  ;;  %v44_v14 = vld [vmem:[#allocation5 + $0x8] sm:$0xff]  ;;  %v43_v15 = vld [vmem:[#allocation5] sm:$0xff]  ;;  %v42_v16 = vld [vmem:[#allocation2] sm:$0xff] }
  0x12   :  { %62 = vmatpush.msra.mxu0 %v55_v3 }
  0x14   :  { %63 = vmatpush.msra.mxu0 %v54_v4 }
  0x16   :  { %64 = vmatpush.msra.mxu0 %v53_v5 }
  0x18   :  { %65 = vmatpush.msra.mxu0 %v52_v6 }
  0x1a   :  { %66 = vmatpush.msra.mxu0 %v51_v7 }
  0x1c   :  { %67 = vmatpush.msra.mxu0 %v50_v8 }
  0x1e   :  { %68 = vmatpush.msra.mxu0 %v49_v9 }
  0x20   :  { %69 = vmatpush.msra.mxu0 %v48_v10 }
  0x22   :  { %70 = vmatpush.msra.mxu0 %v47_v11 }
  0x24   :  { %71 = vmatpush.msra.mxu0 %v46_v12 }
  0x26   :  { %72 = vmatpush.msra.mxu0 %v45_v13 }
  0x28   :  { %73 = vmatpush.msra.mxu0 %v44_v14 }
  0x2a   :  { %74 = vmatpush.msra.mxu0 %v43_v15 }
  0x2b   :  { %75 = vmatmul.f32.vlgmr.msra.gmra.mxu0 %v42_v16 }
  0xa8   :  { %v76_v17 = vpop.f32.mrf.mxu0 }
  0xa9   :  { %79 = vst [vmem:[#allocation7] sm:$0xff] %v76_v17 }
  0xaa   :  { %90 = dma.vmem_to_hbm [thread:$0]  %s86_s1, 128, %s88_s23, [#allocation4]  }
  0xab   :  { %179 = dma.done.wait [#allocation4], 128  }
  0xac   :  { %180 = vsyncadd [#allocation4], 4294967168 }
  0xad   :  { %95 = vsyncpa [#allocation3], 1 }
  0xae   :  { %96 = vsyncpa [#allocation6], 1 }
  0xaf   :  { %97 = vsyncpa [#allocation4], 1 }

</bundles_post_ra>
